<compile_context>
chip_gen: v5e
topology: v5e:2x2
jax: 0.10.0
libtpu: 0.0.40
codegen_flags: <defaults>
</compile_context>

<pallas_src>
import functools

import jax
import jax.numpy as jnp
from jax.experimental import pallas as pl
from jax.experimental.pallas import tpu as pltpu

LAYER_NORM_EPS = 1e-12


def _round_up(x, m):
    return ((x + m - 1) // m) * m


def _embeddings_kernel(summed_ref, ids_ref, value_ref, minhash_ref,
                       tables_ref, value_w_ref, minhash_w_ref,
                       gamma_ref, beta_ref, out_ref, *,
                       num_table_rows, compute_dtype):
    rows = summed_ref.shape[0]
    f32 = jnp.float32
    prec = (jax.lax.Precision.HIGHEST
            if jnp.dtype(compute_dtype) == jnp.dtype(jnp.float32) else None)

    # --- fused gather of the three small tables as one multi-hot MXU matmul.
    # ids already carry the per-table row offsets, so a single (rows, T)
    # multi-hot against the stacked (T, H) table yields the SUM of the three
    # gathered embedding rows.
    ids = ids_ref[...]                                              # (rows, 3)
    col = jax.lax.broadcasted_iota(jnp.int32, (rows, num_table_rows), 1)
    mask = ((col == ids[:, 0:1]) | (col == ids[:, 1:2]) | (col == ids[:, 2:3]))
    one = jnp.asarray(1, dtype=compute_dtype)
    zero = jnp.asarray(0, dtype=compute_dtype)
    hot = jnp.where(mask, one, zero)
    acc = jnp.dot(hot, tables_ref[...],
                  preferred_element_type=f32, precision=prec)

    # --- value / minhash linear layers: activations streamed in native dtype,
    # cast to the MXU dtype only here in VMEM (no extra HBM pass).
    acc = acc + jnp.dot(value_ref[...].astype(compute_dtype), value_w_ref[...],
                        preferred_element_type=f32, precision=prec)
    acc = acc + jnp.dot(minhash_ref[...].astype(compute_dtype),
                        minhash_w_ref[...],
                        preferred_element_type=f32, precision=prec)

    # --- add the pre-summed word-embedding (+ linear biases) stream ---------
    emb = acc + summed_ref[...].astype(f32)

    # --- LayerNorm, single-traversal statistics ------------------------------
    mean = jnp.mean(emb, axis=-1, keepdims=True)
    msq = jnp.mean(emb * emb, axis=-1, keepdims=True)
    var = jnp.maximum(msq - mean * mean, 0.0)
    inv = jax.lax.rsqrt(var + LAYER_NORM_EPS)
    out_ref[...] = ((emb - mean) * inv * gamma_ref[...]
                    + beta_ref[...]).astype(out_ref.dtype)
    # TODO(synk): dropout is identity (eval mode); training dropout not implemented.


def tabular_bert_embeddings(params, input_ids, token_type_ids, position_ids,
                            token_position_ids, value_ids, minhash_vals,
                            *, row_tile=None, compute_dtype=jnp.bfloat16,
                            out_dtype=jnp.bfloat16):
    B, S = input_ids.shape
    H = params["word_emb"].shape[1]
    HASH = params["minhash_w"].shape[1]
    R = B * S

    cd = jnp.dtype(compute_dtype)
    od = jnp.dtype(out_dtype)

    # --- glue kept in XLA: the large-vocab word gather + folded biases ------
    word = jnp.take(params["word_emb"], input_ids.reshape(-1), axis=0)
    bias = (params["value_b"] + params["minhash_b"]).reshape(1, H)
    summed = (word + bias).astype(compute_dtype)

    # Small position-style tables stacked once (tiny), kept VMEM-resident.
    tt_tab = params["token_type_emb"]
    tp_tab = params["token_position_emb"]
    pos_tab = params["position_emb"]
    tables = jnp.concatenate([tt_tab, tp_tab, pos_tab],
                             axis=0).astype(compute_dtype)
    T = tables.shape[0]
    off1 = tt_tab.shape[0]
    off2 = off1 + tp_tab.shape[0]
    ids3 = jnp.stack(
        [token_type_ids.reshape(-1).astype(jnp.int32),
         off1 + token_position_ids.reshape(-1).astype(jnp.int32),
         off2 + position_ids.reshape(-1).astype(jnp.int32)], axis=-1)

    # nn.Linear is y = x @ W.T + b; pre-transpose (cheap, resident weights).
    value_wT = params["value_w"].T.astype(compute_dtype)       # (H, H)
    minhash_wT = params["minhash_w"].T.astype(compute_dtype)   # (HASH, H)
    gamma = params["ln_gamma"].reshape(1, H).astype(jnp.float32)
    beta = params["ln_beta"].reshape(1, H).astype(jnp.float32)

    # Activations streamed in their NATIVE dtype (no concat / cast pass).
    value = value_ids.reshape(R, H)
    minhash = minhash_vals.reshape(R, HASH)

    # --- row tiling ----------------------------------------------------------
    align = 16   # bf16 sublane packing (also a multiple of the f32/int32 8)

    def vmem_need(rt):
        # Double-buffered streamed blocks.
        stream = rt * (H * cd.itemsize                      # summed
                       + 3 * 4                              # ids
                       + H * value.dtype.itemsize           # value acts
                       + HASH * minhash.dtype.itemsize      # minhash acts
                       + H * od.itemsize)                   # output
        resident = ((T * H + H * H + HASH * H) * cd.itemsize + 2 * H * 4)
        # In-kernel temporaries: multi-hot, f32 accumulator/emb, casted acts.
        temps = rt * (T * (cd.itemsize + 1) + 2 * H * 4
                      + (H + HASH) * cd.itemsize)
        return 2 * stream + 2 * resident + temps + (6 << 20)

    try:
        phys_vmem = int(pltpu.get_tpu_info().vmem_capacity_bytes)
    except Exception:
        phys_vmem = 64 << 20   # conservative (v7x-sized) fallback
    vmem_cap = min(phys_vmem - (12 << 20), 100 << 20)

    if row_tile is None:
        row_tile = 1024
    row_tile = max(align, _round_up(row_tile, align))
    row_tile = min(row_tile, _round_up(R, align))
    # >= 2 grid steps when the row count allows it (v7x megacore sharding).
    row_tile = min(row_tile, max(align, _round_up(pl.cdiv(R, 2), align)))
    # Shrink to fit the per-generation VMEM cap.
    while vmem_need(row_tile) > vmem_cap and row_tile > align:
        row_tile = max(align, _round_up(row_tile // 2, align))
    # Prefer a tile that divides R (no padding, no out[:R] copy), but never
    # shrink below half the chosen tile.
    if R % row_tile:
        for t in range(row_tile, row_tile // 2, -align):
            if R % t == 0:
                row_tile = t
                break

    Rp = _round_up(R, row_tile)
    if Rp != R:
        pad = Rp - R
        summed = jnp.pad(summed, ((0, pad), (0, 0)))
        ids3 = jnp.pad(ids3, ((0, pad), (0, 0)))
        value = jnp.pad(value, ((0, pad), (0, 0)))
        minhash = jnp.pad(minhash, ((0, pad), (0, 0)))

    grid = (Rp // row_tile,)
    vmem_limit = int(min(vmem_need(row_tile), vmem_cap))

    def row_spec(width):
        return pl.BlockSpec((row_tile, width), lambda i: (i, 0))

    def resident(shape):
        return pl.BlockSpec(shape, lambda i: (0, 0))

    kernel = functools.partial(_embeddings_kernel,
                               num_table_rows=T, compute_dtype=compute_dtype)

    out = pl.pallas_call(
        kernel,
        out_shape=jax.ShapeDtypeStruct((Rp, H), out_dtype),
        grid_spec=pltpu.PrefetchScalarGridSpec(
            num_scalar_prefetch=0,
            grid=grid,
            in_specs=[
                row_spec(H),          # pre-summed word gather + biases
                row_spec(3),          # offset ids [tt, tp+off1, pos+off2]
                row_spec(H),          # value activations (native dtype)
                row_spec(HASH),       # minhash activations (native dtype)
                resident((T, H)),     # stacked small tables
                resident((H, H)),     # value W^T
                resident((HASH, H)),  # minhash W^T
                resident((1, H)),     # LN gamma (f32)
                resident((1, H)),     # LN beta  (f32)
            ],
            out_specs=row_spec(H),
        ),
        compiler_params=pltpu.CompilerParams(
            dimension_semantics=("parallel",),
            vmem_limit_bytes=vmem_limit),
    )(summed, ids3, value, minhash, tables, value_wT, minhash_wT, gamma, beta)

    return out[:R].reshape(B, S, H)


def init_params(key, *, vocab_size, max_position_embeddings, hidden_size,
                hash_input_size):
    ks = jax.random.split(key, 8)
    scale = 0.02
    return {
        "word_emb": scale * jax.random.normal(ks[0], (vocab_size, hidden_size), jnp.float32),
        "position_emb": scale * jax.random.normal(ks[1], (max_position_embeddings, hidden_size), jnp.float32),
        "token_type_emb": scale * jax.random.normal(ks[2], (max_position_embeddings, hidden_size), jnp.float32),
        "token_position_emb": scale * jax.random.normal(ks[3], (max_position_embeddings, hidden_size), jnp.float32),
        # nn.Linear weights stored PyTorch-style (out_features, in_features)
        "value_w": scale * jax.random.normal(ks[4], (hidden_size, hidden_size), jnp.float32),
        "value_b": scale * jax.random.normal(ks[5], (hidden_size,), jnp.float32),
        "minhash_w": scale * jax.random.normal(ks[6], (hidden_size, hash_input_size), jnp.float32),
        "minhash_b": scale * jax.random.normal(ks[7], (hidden_size,), jnp.float32),
        "ln_gamma": jnp.ones((hidden_size,), jnp.float32),
        "ln_beta": jnp.zeros((hidden_size,), jnp.float32),
    }


def reference(params, input_ids, token_type_ids, position_ids,
              token_position_ids, value_ids, minhash_vals):
    """Pure-JAX f32 reference for correctness checking."""
    word = params["word_emb"][input_ids]
    ttype = params["token_type_emb"][token_type_ids]
    tpos = params["token_position_emb"][token_position_ids]
    pos = params["position_emb"][position_ids]
    val = jnp.dot(value_ids, params["value_w"].T,
                  precision=jax.lax.Precision.HIGHEST) + params["value_b"]
    mh = jnp.dot(minhash_vals, params["minhash_w"].T,
                 precision=jax.lax.Precision.HIGHEST) + params["minhash_b"]
    emb = word + ttype + tpos + pos + val + mh
    mean = emb.mean(-1, keepdims=True)
    var = ((emb - mean) ** 2).mean(-1, keepdims=True)
    norm = (emb - mean) / jnp.sqrt(var + LAYER_NORM_EPS)
    return norm * params["ln_gamma"] + params["ln_beta"]


if __name__ == "__main__":
    # Small demo shapes (production sizes would use H=768, MAX_POS=512, which
    # give lane-dense 128-multiple blocks; H=32 here is just for the check).
    B, S, H, HASH = 2, 8, 32, 16
    VOCAB, MAX_POS = 100, 64

    key = jax.random.PRNGKey(0)
    kp, k1, k2, k3, k4 = jax.random.split(key, 5)

    params = init_params(kp, vocab_size=VOCAB, max_position_embeddings=MAX_POS,
                         hidden_size=H, hash_input_size=HASH)

    input_ids = jax.random.randint(k1, (B, S), 0, VOCAB, dtype=jnp.int32)
    token_type_ids = jnp.zeros((B, S), jnp.int32)
    position_ids = jnp.broadcast_to(jnp.arange(S, dtype=jnp.int32), (B, S))
    token_position_ids = jax.random.randint(k2, (B, S), 0, MAX_POS, dtype=jnp.int32)
    value_ids = jax.random.normal(k3, (B, S, H), jnp.float32)
    minhash_vals = jax.random.normal(k4, (B, S, HASH), jnp.float32)

    ref = reference(params, input_ids, token_type_ids, position_ids,
                    token_position_ids, value_ids, minhash_vals)

    # 1) f32 path (strict-ish): highest-precision matmuls, f32 output.
    out_f32 = tabular_bert_embeddings(
        params, input_ids, token_type_ids, position_ids, token_position_ids,
        value_ids, minhash_vals,
        compute_dtype=jnp.float32, out_dtype=jnp.float32)
    out_f32 = jax.block_until_ready(out_f32)
    assert out_f32.shape == (B, S, H)
    assert jnp.allclose(out_f32, ref, atol=1e-4, rtol=1e-4), "f32 mismatch vs reference"

    # 2) Default bf16-streaming fast path (f32 accumulation / LayerNorm,
    #    bf16 output): widened tolerance for bf16 quantization.
    out_bf16 = tabular_bert_embeddings(
        params, input_ids, token_type_ids, position_ids, token_position_ids,
        value_ids, minhash_vals)
    out_bf16 = jax.block_until_ready(out_bf16)
    assert out_bf16.shape == (B, S, H)
    assert out_bf16.dtype == jnp.bfloat16
    assert jnp.allclose(out_bf16.astype(jnp.float32), ref,
                        atol=5e-2, rtol=5e-2), "bf16 mismatch vs reference"

    print("KERNEL_OK")
</pallas_src>

<mosaic_0001>
module attributes {stable_mosaic.version = 11 : i64} {
  func.func @_embeddings_kernel(%arg0: i32, %arg1: memref<16x32xf32, #tpu.memory_space<vmem>>, %arg2: memref<16x3xi32, #tpu.memory_space<vmem>>, %arg3: memref<16x32xf32, #tpu.memory_space<vmem>>, %arg4: memref<16x16xf32, #tpu.memory_space<vmem>>, %arg5: memref<192x32xf32, #tpu.memory_space<vmem>>, %arg6: memref<32x32xf32, #tpu.memory_space<vmem>>, %arg7: memref<16x32xf32, #tpu.memory_space<vmem>>, %arg8: memref<1x32xf32, #tpu.memory_space<vmem>>, %arg9: memref<1x32xf32, #tpu.memory_space<vmem>>, %arg10: memref<16x32xf32, #tpu.memory_space<vmem>>) attributes {dimension_semantics = [#tpu.dimension_semantics<parallel>], iteration_bounds = array<i64: 1>, scalar_prefetch = 0 : i64, scratch_operands = 0 : i64, tpu.core_type = #tpu.core_type<tc>, window_params = [{transform_indices = @transform_0, window_bounds = array<i64: 16, 32>}, {transform_indices = @transform_1, window_bounds = array<i64: 16, 3>}, {transform_indices = @transform_2, window_bounds = array<i64: 16, 32>}, {transform_indices = @transform_3, window_bounds = array<i64: 16, 16>}, {pipeline_mode = #tpu.pipeline_mode<synchronous>, transform_indices = @transform_4, window_bounds = array<i64: 192, 32>}, {pipeline_mode = #tpu.pipeline_mode<synchronous>, transform_indices = @transform_5, window_bounds = array<i64: 32, 32>}, {pipeline_mode = #tpu.pipeline_mode<synchronous>, transform_indices = @transform_6, window_bounds = array<i64: 16, 32>}, {pipeline_mode = #tpu.pipeline_mode<synchronous>, transform_indices = @transform_7, window_bounds = array<i64: 1, 32>}, {pipeline_mode = #tpu.pipeline_mode<synchronous>, transform_indices = @transform_8, window_bounds = array<i64: 1, 32>}, {transform_indices = @transform_9, window_bounds = array<i64: 16, 32>}]} {
    %c0 = arith.constant 0 : index
    %c0_0 = arith.constant 0 : index
    %0 = vector.load %arg2[%c0, %c0_0] : memref<16x3xi32, #tpu.memory_space<vmem>>, vector<16x3xi32>
    %1 = tpu.iota {dimensions = array<i32: 1>} : vector<16x192xi32>
    %2 = vector.extract_strided_slice %0 {offsets = [0, 0], sizes = [16, 1], strides = [1, 1]} : vector<16x3xi32> to vector<16x1xi32>
    %3 = vector.broadcast %2 : vector<16x1xi32> to vector<16x192xi32>
    %4 = arith.cmpi eq, %1, %3 : vector<16x192xi32>
    %5 = vector.extract_strided_slice %0 {offsets = [0, 1], sizes = [16, 1], strides = [1, 1]} : vector<16x3xi32> to vector<16x1xi32>
    %6 = vector.broadcast %5 : vector<16x1xi32> to vector<16x192xi32>
    %7 = arith.cmpi eq, %1, %6 : vector<16x192xi32>
    %8 = arith.ori %4, %7 : vector<16x192xi1>
    %9 = vector.extract_strided_slice %0 {offsets = [0, 2], sizes = [16, 1], strides = [1, 1]} : vector<16x3xi32> to vector<16x1xi32>
    %10 = vector.broadcast %9 : vector<16x1xi32> to vector<16x192xi32>
    %11 = arith.cmpi eq, %1, %10 : vector<16x192xi32>
    %12 = arith.ori %8, %11 : vector<16x192xi1>
    %cst = arith.constant 1.000000e+00 : f32
    %cst_1 = arith.constant 0.000000e+00 : f32
    %13 = vector.broadcast %cst : f32 to vector<16x192xf32>
    %14 = vector.broadcast %cst_1 : f32 to vector<16x192xf32>
    %15 = arith.select %12, %13, %14 : vector<16x192xi1>, vector<16x192xf32>
    %c0_2 = arith.constant 0 : index
    %c0_3 = arith.constant 0 : index
    %16 = vector.load %arg5[%c0_2, %c0_3] : memref<192x32xf32, #tpu.memory_space<vmem>>, vector<192x32xf32>
    %cst_4 = arith.constant dense<0.000000e+00> : vector<16x32xf32>
    %17 = tpu.matmul %15, %16, %cst_4 {dimension_numbers = #tpu.dot_dimension_numbers<[1], [0], [0], [1], [0, 0, 1, 1], [], []>, precision = #tpu.contract_precision<fp32>} : vector<16x192xf32>, vector<192x32xf32>, vector<16x32xf32> -> vector<16x32xf32>
    %c0_5 = arith.constant 0 : index
    %c0_6 = arith.constant 0 : index
    %18 = vector.load %arg3[%c0_5, %c0_6] : memref<16x32xf32, #tpu.memory_space<vmem>>, vector<16x32xf32>
    %c0_7 = arith.constant 0 : index
    %c0_8 = arith.constant 0 : index
    %19 = vector.load %arg6[%c0_7, %c0_8] : memref<32x32xf32, #tpu.memory_space<vmem>>, vector<32x32xf32>
    %cst_9 = arith.constant dense<0.000000e+00> : vector<16x32xf32>
    %20 = tpu.matmul %18, %19, %cst_9 {dimension_numbers = #tpu.dot_dimension_numbers<[1], [0], [0], [1], [0, 0, 1, 1], [], []>, precision = #tpu.contract_precision<fp32>} : vector<16x32xf32>, vector<32x32xf32>, vector<16x32xf32> -> vector<16x32xf32>
    %21 = arith.addf %17, %20 : vector<16x32xf32>
    %c0_10 = arith.constant 0 : index
    %c0_11 = arith.constant 0 : index
    %22 = vector.load %arg4[%c0_10, %c0_11] : memref<16x16xf32, #tpu.memory_space<vmem>>, vector<16x16xf32>
    %c0_12 = arith.constant 0 : index
    %c0_13 = arith.constant 0 : index
    %23 = vector.load %arg7[%c0_12, %c0_13] : memref<16x32xf32, #tpu.memory_space<vmem>>, vector<16x32xf32>
    %cst_14 = arith.constant dense<0.000000e+00> : vector<16x32xf32>
    %24 = tpu.matmul %22, %23, %cst_14 {dimension_numbers = #tpu.dot_dimension_numbers<[1], [0], [0], [1], [0, 0, 1, 1], [], []>, precision = #tpu.contract_precision<fp32>} : vector<16x16xf32>, vector<16x32xf32>, vector<16x32xf32> -> vector<16x32xf32>
    %25 = arith.addf %21, %24 : vector<16x32xf32>
    %c0_15 = arith.constant 0 : index
    %c0_16 = arith.constant 0 : index
    %26 = vector.load %arg1[%c0_15, %c0_16] : memref<16x32xf32, #tpu.memory_space<vmem>>, vector<16x32xf32>
    %27 = arith.addf %25, %26 : vector<16x32xf32>
    %cst_17 = arith.constant dense<0.000000e+00> : vector<16xf32>
    %28 = vector.multi_reduction <add>, %27, %cst_17 [1] : vector<16x32xf32> to vector<16xf32>
    %29 = vector.shape_cast %28 : vector<16xf32> to vector<16x1xf32>
    %cst_18 = arith.constant 3.200000e+01 : f32
    %30 = vector.broadcast %cst_18 : f32 to vector<16x1xf32>
    %31 = arith.divf %29, %30 : vector<16x1xf32>
    %32 = arith.mulf %27, %27 : vector<16x32xf32>
    %cst_19 = arith.constant dense<0.000000e+00> : vector<16xf32>
    %33 = vector.multi_reduction <add>, %32, %cst_19 [1] : vector<16x32xf32> to vector<16xf32>
    %34 = vector.shape_cast %33 : vector<16xf32> to vector<16x1xf32>
    %cst_20 = arith.constant 3.200000e+01 : f32
    %35 = vector.broadcast %cst_20 : f32 to vector<16x1xf32>
    %36 = arith.divf %34, %35 : vector<16x1xf32>
    %37 = arith.mulf %31, %31 : vector<16x1xf32>
    %38 = arith.subf %36, %37 : vector<16x1xf32>
    %cst_21 = arith.constant 0.000000e+00 : f32
    %39 = vector.broadcast %cst_21 : f32 to vector<16x1xf32>
    %40 = arith.maximumf %38, %39 : vector<16x1xf32>
    %cst_22 = arith.constant 9.99999996E-13 : f32
    %41 = vector.broadcast %cst_22 : f32 to vector<16x1xf32>
    %42 = arith.addf %40, %41 : vector<16x1xf32>
    %43 = math.rsqrt %42 : vector<16x1xf32>
    %44 = vector.broadcast %31 : vector<16x1xf32> to vector<16x32xf32>
    %45 = arith.subf %27, %44 : vector<16x32xf32>
    %46 = vector.broadcast %43 : vector<16x1xf32> to vector<16x32xf32>
    %47 = arith.mulf %45, %46 : vector<16x32xf32>
    %c0_23 = arith.constant 0 : index
    %c0_24 = arith.constant 0 : index
    %48 = vector.load %arg8[%c0_23, %c0_24] : memref<1x32xf32, #tpu.memory_space<vmem>>, vector<1x32xf32>
    %49 = vector.broadcast %48 : vector<1x32xf32> to vector<16x32xf32>
    %50 = arith.mulf %47, %49 : vector<16x32xf32>
    %c0_25 = arith.constant 0 : index
    %c0_26 = arith.constant 0 : index
    %51 = vector.load %arg9[%c0_25, %c0_26] : memref<1x32xf32, #tpu.memory_space<vmem>>, vector<1x32xf32>
    %52 = vector.broadcast %51 : vector<1x32xf32> to vector<16x32xf32>
    %53 = arith.addf %50, %52 : vector<16x32xf32>
    %c0_27 = arith.constant 0 : index
    %c0_28 = arith.constant 0 : index
    %54 = vector.load %arg10[%c0_27, %c0_28] : memref<16x32xf32, #tpu.memory_space<vmem>>, vector<16x32xf32>
    tpu.vector_store %arg10[%c0_27, %c0_28], %53 {strides = array<i32>} : memref<16x32xf32, #tpu.memory_space<vmem>>, vector<16x32xf32>,
    return
  }
  func.func @transform_0(%arg0: i32) -> (i32, i32) {
    %c0_i32 = arith.constant 0 : i32
    %c0_i32_0 = arith.constant 0 : i32
    return %arg0, %c0_i32 : i32, i32
  }
  func.func @transform_1(%arg0: i32) -> (i32, i32) {
    %c0_i32 = arith.constant 0 : i32
    %c0_i32_0 = arith.constant 0 : i32
    return %arg0, %c0_i32 : i32, i32
  }
  func.func @transform_2(%arg0: i32) -> (i32, i32) {
    %c0_i32 = arith.constant 0 : i32
    %c0_i32_0 = arith.constant 0 : i32
    return %arg0, %c0_i32 : i32, i32
  }
  func.func @transform_3(%arg0: i32) -> (i32, i32) {
    %c0_i32 = arith.constant 0 : i32
    %c0_i32_0 = arith.constant 0 : i32
    return %arg0, %c0_i32 : i32, i32
  }
  func.func @transform_4(%arg0: i32) -> (i32, i32) {
    %c0_i32 = arith.constant 0 : i32
    %c0_i32_0 = arith.constant 0 : i32
    %c0_i32_1 = arith.constant 0 : i32
    return %c0_i32, %c0_i32_0 : i32, i32
  }
  func.func @transform_5(%arg0: i32) -> (i32, i32) {
    %c0_i32 = arith.constant 0 : i32
    %c0_i32_0 = arith.constant 0 : i32
    %c0_i32_1 = arith.constant 0 : i32
    return %c0_i32, %c0_i32_0 : i32, i32
  }
  func.func @transform_6(%arg0: i32) -> (i32, i32) {
    %c0_i32 = arith.constant 0 : i32
    %c0_i32_0 = arith.constant 0 : i32
    %c0_i32_1 = arith.constant 0 : i32
    return %c0_i32, %c0_i32_0 : i32, i32
  }
  func.func @transform_7(%arg0: i32) -> (i32, i32) {
    %c0_i32 = arith.constant 0 : i32
    %c0_i32_0 = arith.constant 0 : i32
    %c0_i32_1 = arith.constant 0 : i32
    return %c0_i32, %c0_i32_0 : i32, i32
  }
  func.func @transform_8(%arg0: i32) -> (i32, i32) {
    %c0_i32 = arith.constant 0 : i32
    %c0_i32_0 = arith.constant 0 : i32
    %c0_i32_1 = arith.constant 0 : i32
    return %c0_i32, %c0_i32_0 : i32, i32
  }
  func.func @transform_9(%arg0: i32) -> (i32, i32) {
    %c0_i32 = arith.constant 0 : i32
    %c0_i32_0 = arith.constant 0 : i32
    return %arg0, %c0_i32 : i32, i32
  }
}

</mosaic_0001>

<bundles_post_ra>
// kernel: tpu_custom_call.1
= control target key start
LH: loop header
LB: loop body
LE: loop exit
PB: predicated region body
PF: predicated region fallthrough
CT: control target
= control target key end

     0   :  { %v1334_v2 = vmov 2   ;;  %v1335_v3 = vmov 0   ;;  %vm2086_vm0 = vcmask 261120   ;;  %v1336_v14 = vmov 1   ;;  %s2076_s0 = inlined_call_operand.vmem [shape: f32[16,32], index: 0, kind: input, shape index: {}]   ;;  %s2077_s1 = inlined_call_operand.vmem [shape: s32[16,3], index: 1, kind: input, shape index: {}]   ;;  %s2078_s2 = inlined_call_operand.vmem [shape: f32[16,32], index: 2, kind: input, shape index: {}]   ;;  %s2079_s3 = inlined_call_operand.vmem [shape: f32[16,16], index: 3, kind: input, shape index: {}]   ;;  %s2080_s4 = inlined_call_operand.vmem [shape: f32[192,32], index: 4, kind: input, shape index: {}]   ;;  %s2081_s5 = inlined_call_operand.vmem [shape: f32[32,32], index: 5, kind: input, shape index: {}]   ;;  %s2082_s6 = inlined_call_operand.vmem [shape: f32[16,32], index: 6, kind: input, shape index: {}]   ;;  %s2083_s7 = inlined_call_operand.vmem [shape: f32[1,32], index: 7, kind: input, shape index: {}]   ;;  %s2084_s8 = inlined_call_operand.vmem [shape: f32[1,32], index: 8, kind: input, shape index: {}]   ;;  %s2085_s9 = inlined_call_operand.hbm [shape: f32[16,32], index: 9, kind: output, shape index: {}]  }
   0x1   :  { %v33_v0 = vld [vmem:[%s2077_s1] sm:$0xff]  ;;  %v109_v1 = vld [vmem:[%s2081_s5 + $0x18] sm:$0xff]  ;;  %1295 = vset.pattern.permute.xlu1 %v1334_v2  ;;  %1293 = vset.pattern.permute.xlu0 %v1335_v3  ;;  %v108_v5 = vld [vmem:[%s2081_s5 + $0x10] sm:$0xff] }
   0x2   :  { %v1400_v4 = vand.u32 4294901760, %v109_v1  ;;  %v107_v6 = vld [vmem:[%s2081_s5 + $0x8] sm:$0xff]  ;;  %v106_v7 = vld [vmem:[%s2081_s5] sm:$0xff]  ;;  %63 = vperm.xlu1 %1295, %v33_v0   ;;  %39 = vperm.xlu0 %1293, %v33_v0   ;;  %v1411_v8 = vand.u32 4294901760, %v108_v5  ;;  %v95_v12 = vld [vmem:[%s2080_s4 + $0x78] sm:$0xff] }
   0x3   :  { %v1413_v9 = vand.u32 4294901760, %v107_v6  ;;  %v1415_v10 = vand.u32 4294901760, %v106_v7  ;;  %v105_v11 = vld [vmem:[%s2078_s2 + $0x8] sm:$0xff]  ;;  %1297 = vset.pattern.permute.xlu2 %v1336_v14  ;;  %v1431_v17 = vand.u32 4294901760, %v95_v12  ;;  %v104_v18 = vld [vmem:[%s2078_s2] sm:$0xff]  ;;  %v94_v23 = vld [vmem:[%s2080_s4 + $0x70] sm:$0xff] }
   0x4   :  { %v34_v13 = vld [vmem:[%s2077_s1 + $0x8] sm:$0xff]  ;;  %v1427_v15 = vsub.f32 %v109_v1, %v1400_v4  ;;  %1276 = vmatpush.msra.mxu2 %v1400_v4  ;;  %v115_v16 = vsel %vm2086_vm0, %v105_v11, 0  ;;  %v1437_v19 = vsub.f32 %v108_v5, %v1411_v8  ;;  %130 = vmatpush.msra.mxu0 %v1400_v4  ;;  %v112_v25 = vsel %vm2086_vm0, %v104_v18, 0 }
   0x5   :  { %52 = vperm.xlu2 %1297, %v34_v13   ;;  %v1440_v20 = vsub.f32 %v107_v6, %v1413_v9  ;;  %v1443_v21 = vsub.f32 %v106_v7, %v1415_v10  ;;  %v1445_v22 = vand.u32 4294901760, %v115_v16 }
   0x6   :  { %v168_v24 = vand.u32 4294901760, %v1427_v15  ;;  %1277 = vmatpush.msra.mxu2 %v1411_v8 }
   0x7   :  { %14 = vsyncpa [#allocation3], 0  ;;  %v174_v26 = vand.u32 4294901760, %v1437_v19  ;;  %v180_v27 = vand.u32 4294901760, %v1440_v20  ;;  %v186_v28 = vand.u32 4294901760, %v1443_v21  ;;  %v1458_v29 = vsub.f32 %v115_v16, %v1445_v22  ;;  %132 = vmatpush.msra.mxu0 %v1411_v8  ;;  %v93_v36 = vld [vmem:[%s2080_s4 + $0x68] sm:$0xff] }
   0x8   :  { %v169_v30 = vsub.f32 %v1427_v15, %v168_v24  ;;  %1278 = vmatpush.msra.mxu2 %v1413_v9  ;;  %v1465_v31 = vand.u32 4294901760, %v112_v25  ;;  %v1475_v35 = vand.u32 4294901760, %v94_v23  ;;  %v92_v39 = vld [vmem:[%s2080_s4 + $0x60] sm:$0xff]  ;;  %v1494_v43 = vsub.f32 %v95_v12, %v1431_v17  ;;  %v91_v46 = vld [vmem:[%s2080_s4 + $0x58] sm:$0xff]  ;;  %v90_v52 = vld [vmem:[%s2080_s4 + $0x50] sm:$0xff]  ;;  %s1252_s15 = sshll.u32 %s2085_s9, 4  ;;  %s1253_s15 = int_to_ptr.hbm [resolvable:$true] %s1252_s15 }
   0x9   :  { %v175_v32 = vsub.f32 %v1437_v19, %v174_v26  ;;  %v181_v33 = vsub.f32 %v1440_v20, %v180_v27  ;;  %v147_v34 = vand.u32 4294901760, %v1458_v29  ;;  %134 = vmatpush.msra.mxu0 %v1413_v9  ;;  %v187_v41 = vsub.f32 %v1443_v21, %v186_v28  ;;  %v89_v58 = vld [vmem:[%s2080_s4 + $0x48] sm:$0xff]  ;;  %v88_v62 = vld [vmem:[%s2080_s4 + $0x40] sm:$0xff]  ;;  %v87_v5 = vld [vmem:[%s2080_s4 + $0x38] sm:$0xff]  ;;  %s1341_s16 = smov 128   ;;  %s1342_s17 = smov 8  }
   0xa   :  { %v170_v37 = vand.u32 4294901760, %v169_v30  ;;  %1279 = vmatpush.msra.mxu2 %v1415_v10  ;;  %v1482_v38 = vsub.f32 %v112_v25, %v1465_v31  ;;  %1296 = vset.pattern.permute.xlu1 %v1335_v3  ;;  %v1496_v44 = vand.u32 4294901760, %v93_v36  ;;  %v1504_v49 = vsub.f32 %v94_v23, %v1475_v35 }
   0xb   :  { %1294 = vset.pattern.permute.xlu0 %v1336_v14  ;;  %v176_v40 = vand.u32 4294901760, %v175_v32  ;;  %v148_v42 = vsub.f32 %v1458_v29, %v147_v34  ;;  %42 = vperm.xlu1 %1296, %v34_v13   ;;  %v182_v47 = vand.u32 4294901760, %v181_v33  ;;  %v1506_v50 = vand.u32 4294901760, %v92_v39  ;;  %v86_v14 = vld [vmem:[%s2080_s4 + $0x30] sm:$0xff] }
   0xc   :  { %49 = vperm.xlu0 %1294, %v33_v0   ;;  %v139_v45 = vand.u32 4294901760, %v1482_v38  ;;  %1280 = vmatpush.msra.mxu3 %v170_v37  ;;  %v188_v53 = vand.u32 4294901760, %v187_v41  ;;  %v389_v54 = vand.u32 4294901760, %v1494_v43  ;;  %v1517_v55 = vsub.f32 %v93_v36, %v1496_v44 }
   0xd   :  { %1298 = vset.pattern.permute.xlu2 %v1334_v2  ;;  %v149_v48 = vand.u32 4294901760, %v148_v42  ;;  %213 = vmatpush.msrb.mxu2 %v1427_v15  ;;  %v1519_v56 = vand.u32 4294901760, %v91_v46  ;;  %v395_v59 = vand.u32 4294901760, %v1504_v49  ;;  %v1528_v60 = vsub.f32 %v92_v39, %v1506_v50  ;;  %v84_v39 = vld [vmem:[%s2080_s4 + $0x20] sm:$0xff]  ;;  %v83_v42 = vld [vmem:[%s2080_s4 + $0x18] sm:$0xff] }
   0xe   :  { %66 = vperm.xlu2 %1298, %v34_v13   ;;  %v140_v51 = vsub.f32 %v1482_v38, %v139_v45  ;;  %1281 = vmatpush.msra.mxu3 %v176_v40  ;;  %v1530_v61 = vand.u32 4294901760, %v90_v52  ;;  %v390_v63 = vsub.f32 %v1494_v43, %v389_v54  ;;  %v401_v0 = vand.u32 4294901760, %v1517_v55 }
   0xf   :  { %150 = vmatmul.f32.vlgmr.msra.gmra.mxu2 %v149_v48  ;;  %171 = vmatpush.msra.mxu1 %v170_v37  ;;  %v1541_v1 = vsub.f32 %v91_v46, %v1519_v56  ;;  %v1543_v3 = vand.u32 4294901760, %v89_v58  ;;  %v1550_v6 = vand.u32 4294901760, %v88_v62  ;;  %v396_v7 = vsub.f32 %v1504_v49, %v395_v59  ;;  %v82_v48 = vld [vmem:[%s2080_s4 + $0x10] sm:$0xff] }
  0x10   :  { %216 = vmatpush.msrb.mxu2 %v1437_v19  ;;  %v141_v57 = vand.u32 4294901760, %v140_v51  ;;  %1282 = vmatpush.msra.mxu3 %v182_v47  ;;  %v407_v11 = vand.u32 4294901760, %v1528_v60  ;;  %v1558_v12 = vsub.f32 %v90_v52, %v1530_v61  ;;  %v1563_v13 = vand.u32 4294901760, %v87_v5 }
  0x11   :  { %136 = vmatpush.msra.mxu0 %v1415_v10  ;;  %177 = vmatpush.msra.mxu1 %v176_v40  ;;  %v391_v16 = vand.u32 4294901760, %v390_v63  ;;  %v402_v18 = vsub.f32 %v1517_v55, %v401_v0  ;;  %v413_v23 = vand.u32 4294901760, %v1541_v1  ;;  %v1574_v25 = vsub.f32 %v89_v58, %v1543_v3  ;;  %v80_v63 = vld [vmem:[%s2080_s4] sm:$0xff] }
  0x12   :  { %219 = vmatpush.msrb.mxu2 %v1440_v20  ;;  %1283 = vmatpush.msra.mxu3 %v188_v53  ;;  %v1579_v15 = vsub.f32 %v88_v62, %v1550_v6  ;;  %v397_v30 = vand.u32 4294901760, %v396_v7  ;;  %v408_v32 = vsub.f32 %v1528_v60, %v407_v11  ;;  %v419_v33 = vand.u32 4294901760, %v1558_v12 }
  0x13   :  { %142 = vmatmul.f32.vlgmr.msra.gmra.mxu0 %v141_v57  ;;  %195 = vmatmul.f32.vlgmr.msra.gmra.mxu3 %v1445_v22  ;;  %v1591_v36 = vand.u32 4294901760, %v86_v14  ;;  %v1596_v37 = vsub.f32 %v87_v5, %v1563_v13  ;;  %v403_v19 = vand.u32 4294901760, %v402_v18  ;;  %v1654_v58 = vand.u32 4294901760, %v82_v48 }
  0x14   :  { %247 = vmatpush.msrb.mxu3 %v1400_v4  ;;  %222 = vmatpush.msrb.mxu2 %v1443_v21  ;;  %v431_v41 = vand.u32 4294901760, %v1579_v15  ;;  %v409_v46 = vand.u32 4294901760, %v408_v32  ;;  %v420_v20 = vsub.f32 %v1558_v12, %v419_v33  ;;  %vm333_vm0 = vcmask 523264  }
  0x15   :  { %183 = vmatpush.msra.mxu1 %v182_v47  ;;  %282 = vmatpush.msrb.mxu0 %v168_v24  ;;  %v85_v24 = vld [vmem:[%s2080_s4 + $0x28] sm:$0xff]  ;;  %v437_v47 = vand.u32 4294901760, %v1596_v37 }
  0x16   :  { %249 = vmatpush.msrb.mxu3 %v1411_v8  ;;  %341 = vmatpush.msra.mxu2 %v1431_v17  ;;  %v1607_v40 = vand.u32 4294901760, %v85_v24  ;;  %v421_v52 = vand.u32 4294901760, %v420_v20 }
  0x17   :  { %225 = vmatmul.f32.vlgmr.msrb.gmra.mxu2 %v1482_v38  ;;  %189 = vmatpush.msra.mxu1 %v188_v53  ;;  %v1639_v38 = vand.u32 4294901760, %v83_v42  ;;  %v438_v62 = vsub.f32 %v1596_v37, %v437_v47 }
  0x18   :  { %251 = vmatpush.msrb.mxu3 %v1413_v9  ;;  %191 = vmatmul.f32.vlgmr.msra.gmra.mxu1 %v1465_v31 }
  0x19   :  { %286 = vmatpush.msrb.mxu0 %v174_v26  ;;  %317 = vmatpush.msrb.mxu1 %v1400_v4  ;;  %v414_v4 = vsub.f32 %v1541_v1, %v413_v23  ;;  %v425_v26 = vand.u32 4294901760, %v1574_v25  ;;  %v1667_v7 = vsub.f32 %v83_v42, %v1639_v38  ;;  %v439_v32 = vand.u32 4294901760, %v438_v62 }
  0x1a   :  { %253 = vmatpush.msrb.mxu3 %v1415_v10  ;;  %343 = vmatpush.msra.mxu2 %v1475_v35 }
  0x1b   :  { %290 = vmatpush.msrb.mxu0 %v180_v27  ;;  %319 = vmatpush.msrb.mxu1 %v1411_v8  ;;  %v1621_v27 = vsub.f32 %v86_v14, %v1591_v36  ;;  %v1623_v8 = vand.u32 4294901760, %v84_v39  ;;  %v415_v51 = vand.u32 4294901760, %v414_v4  ;;  %v426_v21 = vsub.f32 %v1574_v25, %v425_v26 }
  0x1c   :  { %392 = vmatpush.msra.mxu3 %v391_v16  ;;  %345 = vmatpush.msra.mxu2 %v1496_v44 }
  0x1d   :  { %294 = vmatpush.msrb.mxu0 %v186_v28  ;;  %257 = vmatmul.f32.vlgmr.msrb.gmra.mxu3 %v139_v45  ;;  %v1637_v28 = vsub.f32 %v85_v24, %v1607_v40  ;;  %v81_v45 = vld [vmem:[%s2080_s4 + $0x8] sm:$0xff]  ;;  %v443_v53 = vand.u32 4294901760, %v1621_v27  ;;  %v1652_v57 = vsub.f32 %v84_v39, %v1623_v8  ;;  %v1679_v24 = vsub.f32 %v82_v48, %v1654_v58 }
  0x1e   :  { %398 = vmatpush.msra.mxu3 %v397_v30  ;;  %321 = vmatpush.msrb.mxu1 %v1413_v9  ;;  %v432_v9 = vsub.f32 %v1579_v15, %v431_v41  ;;  %v1681_v30 = vand.u32 4294901760, %v80_v63 }
  0x1f   :  { %230 = vmatmul.f32.gmra.mxu2 %v1458_v29  ;;  %296 = vmatmul.f32.vlgmr.msrb.gmra.mxu0 %v1465_v31  ;;  %v449_v5 = vand.u32 4294901760, %v1637_v28  ;;  %v444_v16 = vsub.f32 %v1621_v27, %v443_v53  ;;  %v455_v18 = vand.u32 4294901760, %v1652_v57  ;;  %v467_v42 = vand.u32 4294901760, %v1679_v24 }
  0x20   :  { %404 = vmatpush.msra.mxu3 %v403_v19  ;;  %323 = vmatpush.msrb.mxu1 %v1415_v10  ;;  %v427_v10 = vand.u32 4294901760, %v426_v21  ;;  %v433_v14 = vand.u32 4294901760, %v432_v9  ;;  %v461_v19 = vand.u32 4294901760, %v1667_v7 }
  0x21   :  { %325 = vmatmul.f32.vlgmr.msrb.gmra.mxu1 %v1465_v31  ;;  %347 = vmatpush.msra.mxu2 %v1506_v50  ;;  %v1669_v31 = vand.u32 4294901760, %v81_v45  ;;  %v450_v39 = vsub.f32 %v1637_v28, %v449_v5  ;;  %v445_v29 = vand.u32 4294901760, %v444_v16 }
  0x22   :  { %410 = vmatpush.msra.mxu3 %v409_v46  ;;  %492 = vmatpush.msra.mxu0 %v1494_v43  ;;  %v1702_v46 = vsub.f32 %v80_v63, %v1681_v30  ;;  %v462_v48 = vsub.f32 %v1667_v7, %v461_v19 }
  0x23   :  { %349 = vmatpush.msra.mxu2 %v1519_v56  ;;  %548 = vmatpush.msra.mxu1 %v1431_v17  ;;  %v1692_v4 = vsub.f32 %v81_v45, %v1669_v31  ;;  %v451_v20 = vand.u32 4294901760, %v450_v39 }
  0x24   :  { %416 = vmatpush.msra.mxu3 %v415_v51  ;;  %495 = vmatpush.msra.mxu0 %v1504_v49  ;;  %v479_v9 = vand.u32 4294901760, %v1702_v46  ;;  %v463_v45 = vand.u32 4294901760, %v462_v48  ;;  %v101_v49 = vld [vmem:[%s2080_s4 + $0xa8] sm:$0xff] }
  0x25   :  { %263 = vmatmul.f32.gmra.mxu3 %v147_v34  ;;  %351 = vmatpush.msra.mxu2 %v1530_v61  ;;  %v456_v34 = vsub.f32 %v1652_v57, %v455_v18  ;;  %v473_v51 = vand.u32 4294901760, %v1692_v4 }
  0x26   :  { %422 = vmatpush.msra.mxu3 %v421_v52  ;;  %498 = vmatpush.msra.mxu0 %v1517_v55  ;;  %v480_v63 = vsub.f32 %v1702_v46, %v479_v9 }
  0x27   :  { %300 = vmatmul.f32.gmra.mxu0 %v1445_v22  ;;  %353 = vmatpush.msra.mxu2 %v1543_v3  ;;  %v457_v21 = vand.u32 4294901760, %v456_v34  ;;  %v474_v52 = vsub.f32 %v1692_v4, %v473_v51 }
  0x28   :  { %428 = vmatpush.msra.mxu3 %v427_v10  ;;  %550 = vmatpush.msra.mxu1 %v1475_v35 }
  0x29   :  { %329 = vmatmul.f32.gmra.mxu1 %v1445_v22  ;;  %355 = vmatpush.msra.mxu2 %v1550_v6  ;;  %v468_v22 = vsub.f32 %v1679_v24, %v467_v42  ;;  %v475_v10 = vand.u32 4294901760, %v474_v52 }
  0x2a   :  { %434 = vmatpush.msra.mxu3 %v433_v14  ;;  %501 = vmatpush.msra.mxu0 %v1528_v60  ;;  %v481_v14 = vand.u32 4294901760, %v480_v63  ;;  %v1338_v63 = vmov 0.0  }
  0x2b   :  { %552 = vmatpush.msra.mxu1 %v1496_v44  ;;  %357 = vmatpush.msra.mxu2 %v1563_v13  ;;  %v469_v62 = vand.u32 4294901760, %v468_v22 }
  0x2c   :  { %440 = vmatpush.msra.mxu3 %v439_v32  ;;  %504 = vmatpush.msra.mxu0 %v1541_v1  ;;  %v99_v1 = vld [vmem:[%s2080_s4 + $0x98] sm:$0xff] }
  0x2d   :  { %554 = vmatpush.msra.mxu1 %v1506_v50  ;;  %359 = vmatpush.msra.mxu2 %v1591_v36 }
  0x2e   :  { %446 = vmatpush.msra.mxu3 %v445_v29  ;;  %507 = vmatpush.msra.mxu0 %v1558_v12  ;;  %v1849_v12 = vand.u32 4294901760, %v99_v1 }
  0x2f   :  { %556 = vmatpush.msra.mxu1 %v1519_v56  ;;  %361 = vmatpush.msra.mxu2 %v1607_v40 }
  0x30   :  { %452 = vmatpush.msra.mxu3 %v451_v20  ;;  %510 = vmatpush.msra.mxu0 %v1574_v25 }
  0x31   :  { %558 = vmatpush.msra.mxu1 %v1530_v61  ;;  %363 = vmatpush.msra.mxu2 %v1623_v8 }
  0x32   :  { %458 = vmatpush.msra.mxu3 %v457_v21  ;;  %513 = vmatpush.msra.mxu0 %v1579_v15 }
  0x33   :  { %560 = vmatpush.msra.mxu1 %v1543_v3  ;;  %365 = vmatpush.msra.mxu2 %v1639_v38 }
  0x34   :  { %464 = vmatpush.msra.mxu3 %v463_v45  ;;  %516 = vmatpush.msra.mxu0 %v1596_v37 }
  0x35   :  { %562 = vmatpush.msra.mxu1 %v1550_v6  ;;  %367 = vmatpush.msra.mxu2 %v1654_v58 }
  0x36   :  { %470 = vmatpush.msra.mxu3 %v469_v62  ;;  %519 = vmatpush.msra.mxu0 %v1621_v27  ;;  %v1337_v62 = vmov 1.0  }
  0x37   :  { %564 = vmatpush.msra.mxu1 %v1563_v13  ;;  %369 = vmatpush.msra.mxu2 %v1669_v31 }
  0x38   :  { %476 = vmatpush.msra.mxu3 %v475_v10  ;;  %522 = vmatpush.msra.mxu0 %v1637_v28  ;;  %v96_v28 = vld [vmem:[%s2080_s4 + $0x80] sm:$0xff] }
  0x39   :  { %566 = vmatpush.msra.mxu1 %v1591_v36  ;;  %371 = vmatpush.msra.mxu2 %v1681_v30 }
  0x3a   :  { %482 = vmatpush.msra.mxu3 %v481_v14  ;;  %525 = vmatpush.msra.mxu0 %v1652_v57  ;;  %v1888_v57 = vand.u32 4294901760, %v96_v28 }
  0x3b   :  { %568 = vmatpush.msra.mxu1 %v1607_v40  ;;  %593 = vmatpush.msrb.mxu2 %v389_v54  ;;  %v1823_v54 = vand.u32 4294901760, %v101_v49 }
  0x3c   :  { %662 = vmatpush.msrb.mxu3 %v1431_v17  ;;  %528 = vmatpush.msra.mxu0 %v1667_v7 }
  0x3d   :  { %570 = vmatpush.msra.mxu1 %v1623_v8  ;;  %597 = vmatpush.msrb.mxu2 %v395_v59 }
  0x3e   :  { %664 = vmatpush.msrb.mxu3 %v1475_v35  ;;  %531 = vmatpush.msra.mxu0 %v1679_v24  ;;  %v102_v35 = vld [vmem:[%s2080_s4 + $0xb0] sm:$0xff]  ;;  %v1899_v24 = vsub.f32 %v96_v28, %v1888_v57 }
  0x3f   :  { %572 = vmatpush.msra.mxu1 %v1639_v38  ;;  %601 = vmatpush.msrb.mxu2 %v401_v0  ;;  %v1839_v0 = vsub.f32 %v101_v49, %v1823_v54 }
  0x40   :  { %666 = vmatpush.msrb.mxu3 %v1496_v44  ;;  %534 = vmatpush.msra.mxu0 %v1692_v4  ;;  %v1816_v44 = vand.u32 4294901760, %v102_v35  ;;  %v793_v29 = vand.u32 4294901760, %v1899_v24 }
  0x41   :  { %574 = vmatpush.msra.mxu1 %v1654_v58  ;;  %605 = vmatpush.msrb.mxu2 %v407_v11  ;;  %v763_v11 = vand.u32 4294901760, %v1839_v0 }
  0x42   :  { %668 = vmatpush.msrb.mxu3 %v1506_v50  ;;  %537 = vmatpush.msra.mxu0 %v1702_v46  ;;  %v1826_v55 = vsub.f32 %v102_v35, %v1816_v44  ;;  %v794_v46 = vsub.f32 %v1899_v24, %v793_v29 }
  0x43   :  { %576 = vmatpush.msra.mxu1 %v1669_v31  ;;  %609 = vmatpush.msrb.mxu2 %v413_v23  ;;  %v98_v23 = vld [vmem:[%s2080_s4 + $0x90] sm:$0xff]  ;;  %v764_v15 = vsub.f32 %v1839_v0, %v763_v11 }
  0x44   :  { %670 = vmatpush.msrb.mxu3 %v1519_v56  ;;  %1299 = vset.pattern.permute.xlu0 %v1334_v2  ;;  %v103_v2 = vld [vmem:[%s2080_s4 + $0xb8] sm:$0xff]  ;;  %v100_v56 = vld [vmem:[%s2080_s4 + $0xa0] sm:$0xff]  ;;  %v757_v60 = vand.u32 4294901760, %v1826_v55  ;;  %v795_v20 = vand.u32 4294901760, %v794_v46 }
  0x45   :  { %578 = vmatpush.msra.mxu1 %v1681_v30  ;;  %613 = vmatpush.msrb.mxu2 %v419_v33  ;;  %v1807_v17 = vand.u32 4294901760, %v103_v2  ;;  %v1861_v33 = vand.u32 4294901760, %v98_v23 }
  0x46   :  { %672 = vmatpush.msrb.mxu3 %v1530_v61  ;;  %v1836_v61 = vand.u32 4294901760, %v100_v56 }
  0x47   :  { %617 = vmatpush.msrb.mxu2 %v425_v26  ;;  %709 = vmatpush.msrb.mxu0 %v1807_v17  ;;  %v1814_v43 = vsub.f32 %v103_v2, %v1807_v17  ;;  %v97_v26 = vld [vmem:[%s2080_s4 + $0x88] sm:$0xff] }
  0x48   :  { %674 = vmatpush.msrb.mxu3 %v1543_v3  ;;  %v1872_v27 = vand.u32 4294901760, %v97_v26 }
  0x49   :  { %621 = vmatpush.msrb.mxu2 %v431_v41  ;;  %711 = vmatpush.msrb.mxu0 %v1816_v44  ;;  %v751_v50 = vand.u32 4294901760, %v1814_v43 }
  0x4a   :  { %676 = vmatpush.msrb.mxu3 %v1550_v6  ;;  %v758_v6 = vsub.f32 %v1826_v55, %v757_v60 }
  0x4b   :  { %625 = vmatpush.msrb.mxu2 %v437_v47  ;;  %v752_v59 = vsub.f32 %v1814_v43, %v751_v50  ;;  %713 = vmatpush.msrb.mxu0 %v1823_v54 }
  0x4c   :  { %678 = vmatpush.msrb.mxu3 %v1563_v13  ;;  %v1852_v13 = vsub.f32 %v100_v56, %v1836_v61  ;;  %v759_v25 = vand.u32 4294901760, %v758_v6 }
  0x4d   :  { %629 = vmatpush.msrb.mxu2 %v443_v53  ;;  %v753_v3 = vand.u32 4294901760, %v752_v59  ;;  %715 = vmatpush.msrb.mxu0 %v1836_v61 }
  0x4e   :  { %680 = vmatpush.msrb.mxu3 %v1591_v36  ;;  %v1864_v36 = vsub.f32 %v99_v1, %v1849_v12  ;;  %v769_v37 = vand.u32 4294901760, %v1852_v13 }
  0x4f   :  { %633 = vmatpush.msrb.mxu2 %v449_v5  ;;  %754 = vmatpush.msrb.mxu1 %v753_v3  ;;  %v35_v5 = vlaneseq  ;;  %v971_v3 = vld [vmem:[%s2082_s6 + $0x8] sm:$0xff] }
  0x50   :  { %682 = vmatpush.msrb.mxu3 %v1607_v40  ;;  %717 = vmatpush.msrb.mxu0 %v1849_v12  ;;  %v765_v40 = vand.u32 4294901760, %v764_v15  ;;  %v775_v41 = vand.u32 4294901760, %v1864_v36  ;;  %v770_v47 = vsub.f32 %v1852_v13, %v769_v37 }
  0x51   :  { %637 = vmatpush.msrb.mxu2 %v455_v18  ;;  %760 = vmatpush.msrb.mxu1 %v759_v25  ;;  %v36_v34 = vand.u32 127, %v35_v5  ;;  %v1948_v25 = vand.u32 4294901760, %v971_v3  ;;  %v970_v5 = vld [vmem:[%s2082_s6] sm:$0xff] }
  0x52   :  { %684 = vmatpush.msrb.mxu3 %v1623_v8  ;;  %719 = vmatpush.msrb.mxu0 %v1861_v33  ;;  %v1875_v8 = vsub.f32 %v98_v23, %v1861_v33  ;;  %v771_v7 = vand.u32 4294901760, %v770_v47 }
  0x53   :  { %641 = vmatpush.msrb.mxu2 %v461_v19  ;;  %766 = vmatpush.msrb.mxu1 %v765_v40  ;;  %v37_v48 = vadd.s32 128, %v36_v34  ;;  %v1962_v28 = vsub.f32 %v971_v3, %v1948_v25 }
  0x54   :  { %686 = vmatpush.msrb.mxu3 %v1639_v38  ;;  %v776_v38 = vsub.f32 %v1864_v36, %v775_v41  ;;  %721 = vmatpush.msrb.mxu0 %v1872_v27  ;;  %v781_v53 = vand.u32 4294901760, %v1875_v8 }
  0x55   :  { %645 = vmatpush.msrb.mxu2 %v467_v42  ;;  %772 = vmatpush.msrb.mxu1 %v771_v7 }
  0x56   :  { %688 = vmatpush.msrb.mxu3 %v1654_v58  ;;  %v1891_v58 = vsub.f32 %v97_v26, %v1872_v27  ;;  %v782_v16 = vsub.f32 %v1875_v8, %v781_v53  ;;  %723 = vmatpush.msrb.mxu0 %v1888_v57 }
  0x57   :  { %649 = vmatpush.msrb.mxu2 %v473_v51 }
  0x58   :  { %690 = vmatpush.msrb.mxu3 %v1669_v31  ;;  %v777_v31 = vand.u32 4294901760, %v776_v38  ;;  %v787_v18 = vand.u32 4294901760, %v1891_v58  ;;  %v783_v19 = vand.u32 4294901760, %v782_v16 }
  0x59   :  { %653 = vmatpush.msrb.mxu2 %v479_v9 }
  0x5a   :  { %692 = vmatpush.msrb.mxu3 %v1681_v30  ;;  %778 = vmatpush.msrb.mxu1 %v777_v31  ;;  %v788_v4 = vsub.f32 %v1891_v58, %v787_v18 }
  0x5c   :  { %784 = vmatpush.msrb.mxu1 %v783_v19  ;;  %v789_v42 = vand.u32 4294901760, %v788_v4 }
  0x5e   :  { %790 = vmatpush.msrb.mxu1 %v789_v42 }
  0x5f   :  { %v53_v39 = vpop.permute.xlu2 %52 }
  0x60   :  { %vm56_vm1 = vcmp.eq.s32.totalorder %v36_v34, %v53_v39  ;;  %796 = vmatpush.msrb.mxu1 %v795_v20  ;;  %vm57_vm2 = vcmp.eq.s32.totalorder %v37_v48, %v53_v39 }
  0x68   :  { %v67_v9 = vpop.permute.xlu2 %66 }
  0x69   :  { %vm70_vm14 = vcmp.eq.s32.totalorder %v36_v34, %v67_v9 }
  0x74   :  { %v40_v30 = vpop.permute.xlu0 %39  ;;  %v64_v32 = vpop.permute.xlu1 %63 }
  0x75   :  { %vm44_vm8 = vcmp.eq.s32.totalorder %v36_v34, %v40_v30  ;;  %vm45_vm10 = vcmp.eq.s32.totalorder %v37_v48, %v40_v30  ;;  %vm68_vm12 = vcmp.eq.s32.totalorder %v36_v34, %v64_v32  ;;  %vm69_vm15 = vcmp.eq.s32.totalorder %v37_v48, %v64_v32 }
  0x7d   :  { %v43_v51 = vpop.permute.xlu1 %42 }
  0x7e   :  { %v50_v21 = vpop.permute.xlu0 %49  ;;  %vm46_vm3 = vcmp.eq.s32.totalorder %v36_v34, %v43_v51  ;;  %vm47_vm4 = vcmp.eq.s32.totalorder %v37_v48, %v43_v51 }
  0x7f   :  { %vm54_vm5 = vcmp.eq.s32.totalorder %v36_v34, %v50_v21  ;;  %vm1908_vm6 = vmor %vm46_vm3, %vm56_vm1  ;;  %vm55_vm7 = vcmp.eq.s32.totalorder %v37_v48, %v50_v21 }
  0x80   :  { %vm1912_vm9 = vmor %vm47_vm4, %vm57_vm2  ;;  %vm71_vm2 = vcmp.eq.s32.totalorder %v37_v48, %v67_v9 }
  0x81   :  { %vm58_vm11 = vmor %vm44_vm8, %vm54_vm5 }
  0x82   :  { %vm59_vm13 = vmor %vm45_vm10, %vm55_vm7 }
  0x83   :  { %vm1916_vm1 = vmor %vm58_vm11, %vm68_vm12 }
  0x84   :  { %vm73_vm3 = vmor %vm59_vm13, %vm69_vm15  ;;  %1264 = vmatmul.msk.f32.vlgmr.msra.gmra.mxu3 %vm1916_vm1, %v1337_v62  ;;  %v76_v10 = vsel %vm1916_vm1, 1.0, %v1338_v63 }
  0x85   :  { %v1925_v14 = vsel %vm73_vm3, 1.0, %v1338_v63  ;;  %vm1929_vm4 = vmor %vm1908_vm6, %vm70_vm14  ;;  %v372_v35 = vsub.f32 %v76_v10, %v76_v10  ;;  %944 = vmatpush.msra.mxu3 %v1807_v17  ;;  %vm972_vm6 = vcmask 130048  }
  0x86   :  { %v335_v49 = vsel %vm333_vm0, %v1925_v14, 0  ;;  %v78_v56 = vsel %vm1929_vm4, 1.0, %v1338_v63  ;;  %vm75_vm5 = vmor %vm1912_vm9, %vm71_vm2 }
  0x87   :  { %539 = vmatmul.f32.vlgmr.msra.gmra.mxu0 %v372_v35  ;;  %v373_v59 = vand.u32 4294901760, %v372_v35  ;;  %v379_v1 = vsub.f32 %v78_v56, %v78_v56  ;;  %946 = vmatpush.msra.mxu3 %v1816_v44  ;;  %v1945_v6 = vsub.f32 %v335_v49, %v335_v49  ;;  %v1952_v15 = vsel %vm75_vm5, 1.0, %v1338_v63 }
  0x88   :  { %816 = vmatpush.msra.mxu0 %v1814_v43 }
  0x89   :  { %581 = vmatmul.f32.vlgmr.msra.gmra.mxu1 %v373_v59  ;;  %v374_v23 = vsub.f32 %v372_v35, %v373_v59  ;;  %948 = vmatpush.msra.mxu3 %v1823_v54  ;;  %v380_v40 = vand.u32 4294901760, %v379_v1  ;;  %v726_v47 = vand.u32 4294901760, %v1945_v6 }
  0x8a   :  { %819 = vmatpush.msra.mxu0 %v1826_v55  ;;  %858 = vmatpush.msra.mxu1 %v1807_v17  ;;  %v338_v17 = vsel %vm333_vm0, %v1952_v15, 0 }
  0x8b   :  { %v375_v26 = vand.u32 4294901760, %v374_v23  ;;  %950 = vmatpush.msra.mxu3 %v1836_v61  ;;  %v381_v38 = vsub.f32 %v379_v1, %v380_v40  ;;  %v727_v43 = vsub.f32 %v1945_v6, %v726_v47 }
  0x8c   :  { %1265 = vmatmul.msk.f32.gmra.mxu3 %vm1929_vm4, %v1337_v62  ;;  %822 = vmatpush.msra.mxu0 %v1839_v0 }
  0x8d   :  { %376 = vmatmul.f32.vlgmr.msra.gmra.mxu2 %v375_v26  ;;  %860 = vmatpush.msra.mxu1 %v1816_v44  ;;  %v1975_v44 = vand.u32 4294901760, %v970_v5  ;;  %v382_v31 = vand.u32 4294901760, %v381_v38 }
  0x8e   :  { %825 = vmatpush.msra.mxu0 %v1852_v13  ;;  %897 = vmatpush.msra.mxu2 %v751_v50  ;;  %v1980_v50 = vsub.f32 %v338_v17, %v338_v17 }
  0x8f   :  { %543 = vmatmul.f32.gmra.mxu0 %v379_v1  ;;  %862 = vmatpush.msra.mxu1 %v1823_v54  ;;  %v1030_v54 = vand.u32 4294901760, %v1962_v28  ;;  %v1035_v7 = vsub.f32 %v970_v5, %v1975_v44 }
  0x90   :  { %952 = vmatpush.msra.mxu3 %v1849_v12  ;;  %828 = vmatpush.msra.mxu0 %v1864_v36  ;;  %v968_v36 = vld [vmem:[%s2079_s3] sm:$0xff]  ;;  %v143_v4 = vpop.f32.mrf.mxu0 }
  0x91   :  { %586 = vmatmul.f32.gmra.mxu1 %v380_v40  ;;  %901 = vmatpush.msra.mxu2 %v757_v60  ;;  %v1036_v55 = vand.u32 4294901760, %v1035_v7  ;;  %v728_v60 = vand.u32 4294901760, %v727_v43  ;;  %v1031_v16 = vsub.f32 %v1962_v28, %v1030_v54 }
  0x92   :  { %864 = vmatpush.msra.mxu1 %v1836_v61  ;;  %954 = vmatpush.msra.mxu3 %v1861_v33  ;;  %v734_v61 = vand.u32 4294901760, %v1980_v50  ;;  %v151_v46 = vpop.f32.mrf.mxu2 }
  0x93   :  { %831 = vmatpush.msra.mxu0 %v1875_v8  ;;  %905 = vmatpush.msra.mxu2 %v763_v11  ;;  %v1037_v0 = vsub.f32 %v1035_v7, %v1036_v55 }
  0x94   :  { %1268 = vmatmul.msk.f32.vlgmr.msrb.gmra.mxu3 %vm1916_vm1, %v1337_v62  ;;  %866 = vmatpush.msra.mxu1 %v1849_v12  ;;  %v735_v11 = vsub.f32 %v1980_v50, %v734_v61  ;;  %v1032_v12 = vand.u32 4294901760, %v1031_v16 }
  0x95   :  { %383 = vmatmul.f32.gmra.mxu2 %v382_v31  ;;  %956 = vmatpush.msra.mxu3 %v1872_v27  ;;  %v1038_v13 = vand.u32 4294901760, %v1037_v0 }
  0x96   :  { %834 = vmatpush.msra.mxu0 %v1891_v58  ;;  %868 = vmatpush.msra.mxu1 %v1861_v33  ;;  %v736_v33 = vand.u32 4294901760, %v735_v11  ;;  %v196_v34 = vpop.f32.mrf.mxu3 }
  0x97   :  { %729 = vmatmul.f32.vlgmr.msrb.gmra.mxu0 %v728_v60  ;;  %909 = vmatpush.msra.mxu2 %v769_v37  ;;  %v974_v37 = vsel %vm972_vm6, %v968_v36, 0  ;;  %v197_v1 = vadd.f32 %v196_v34, %v151_v46 }
  0x98   :  { %958 = vmatpush.msra.mxu3 %v1888_v57  ;;  %837 = vmatpush.msra.mxu0 %v1899_v24 }
  0x99   :  { %1270 = vmatmul.msk.f32.vlgmr.msrb.gmra.mxu1 %vm333_vm0, %v1925_v14  ;;  %913 = vmatpush.msra.mxu2 %v775_v41  ;;  %v997_v41 = vand.u32 4294901760, %v974_v37 }
  0x9a   :  { %870 = vmatpush.msra.mxu1 %v1872_v27  ;;  %994 = vmatpush.msrb.mxu0 %v1948_v25  ;;  %v969_v27 = vld [vmem:[%s2079_s3 + $0x8] sm:$0xff]  ;;  %v226_v21 = vpop.f32.mrf.mxu2 }
  0x9b   :  { %917 = vmatpush.msra.mxu2 %v781_v53  ;;  %1095 = vmatpush.msrb.mxu3 %v1948_v25  ;;  %v998_v8 = vsub.f32 %v974_v37, %v997_v41  ;;  %v977_v53 = vsel %vm972_vm6, %v969_v27, 0 }
  0x9c   :  { %1269 = vmatmul.msk.f32.gmra.mxu3 %vm1929_vm4, %v1337_v62  ;;  %872 = vmatpush.msra.mxu1 %v1888_v57  ;;  %v1005_v58 = vand.u32 4294901760, %v977_v53  ;;  %v297_v42 = vpop.f32.mrf.mxu0 }
  0x9d   :  { %1266 = vmatmul.msk.f32.vlgmr.msrb.gmra.mxu2 %vm1916_vm1, %v1337_v62  ;;  %996 = vmatpush.msrb.mxu0 %v1975_v44  ;;  %v999_v57 = vand.u32 4294901760, %v998_v8 }
  0x9e   :  { %1033 = vmatpush.msrb.mxu1 %v1032_v12  ;;  %921 = vmatpush.msra.mxu2 %v787_v18  ;;  %v1006_v24 = vsub.f32 %v977_v53, %v1005_v58 }
  0x9f   :  { %737 = vmatmul.f32.gmra.mxu0 %v736_v33  ;;  %1097 = vmatpush.msrb.mxu3 %v1975_v44  ;;  %v1000_v18 = vsub.f32 %v998_v8, %v999_v57 }
  0xa0   :  { %1039 = vmatpush.msrb.mxu1 %v1038_v13  ;;  %925 = vmatpush.msra.mxu2 %v793_v29  ;;  %v1007_v32 = vand.u32 4294901760, %v1006_v24  ;;  %v192_v29 = vpop.f32.mrf.mxu1  ;;  %v258_v48 = vpop.f32.mrf.mxu3 }
  0xa1   :  { %1271 = vmatmul.msk.f32.gmra.mxu1 %vm333_vm0, %v1952_v15  ;;  %v1001_v30 = vand.u32 4294901760, %v1000_v18 }
  0xa2   :  { %1065 = vmatpush.msrb.mxu2 %v1962_v28  ;;  %v1008_v39 = vsub.f32 %v1006_v24, %v1007_v32  ;;  %v231_v63 = vpop.f32.mrf.mxu2 }
  0xa3   :  { %v232_v26 = vadd.f32 %v231_v63, %v197_v1 }
  0xa4   :  { %1068 = vmatpush.msrb.mxu2 %v1035_v7  ;;  %1274 = vmatmul.msk.f32.vlgmr.msra.gmra.mxu3 %vm333_vm0, %v1925_v14  ;;  %v1009_v19 = vand.u32 4294901760, %v1008_v39  ;;  %v301_v51 = vpop.f32.mrf.mxu0 }
  0xa5   :  { %1267 = vmatmul.msk.f32.gmra.mxu2 %vm1929_vm4, %v1337_v62 }
  0xa7   :  { %840 = vmatmul.f32.vlgmr.msra.gmra.mxu0 %v1945_v6 }
  0xa8   :  { %1128 = vmatpush.msra.mxu0 %v1030_v54  ;;  %v326_v20 = vpop.f32.mrf.mxu1  ;;  %v264_v9 = vpop.f32.mrf.mxu3 }
  0xa9   :  { %876 = vmatmul.f32.vlgmr.msra.gmra.mxu1 %v726_v47  ;;  %v265_v28 = vadd.f32 %v264_v9, %v232_v26 }
  0xaa   :  { %1157 = vmatpush.msra.mxu1 %v1948_v25  ;;  %1132 = vmatpush.msra.mxu0 %v1036_v55 }
  0xac   :  { %1275 = vmatmul.msk.f32.gmra.mxu3 %vm333_vm0, %v1952_v15  ;;  %1159 = vmatpush.msra.mxu1 %v1975_v44  ;;  %v302_v44 = vadd.f32 %v301_v51, %v265_v28 }
  0xad   :  { %1272 = vmatmul.msk.f32.vlgmr.msra.gmra.mxu2 %vm333_vm0, %v1925_v14  ;;  %v193_v14 = vadd.f32 %v192_v29, %v143_v4 }
  0xaf   :  { %845 = vmatmul.f32.gmra.mxu0 %v1980_v50  ;;  %v227_v56 = vadd.f32 %v226_v21, %v193_v14 }
  0xb0   :  { %v330_v22 = vpop.f32.mrf.mxu1 }
  0xb1   :  { %882 = vmatmul.f32.gmra.mxu1 %v734_v61  ;;  %v259_v3 = vadd.f32 %v258_v48, %v227_v56  ;;  %v331_v7 = vadd.f32 %v330_v22, %v302_v44 }
  0xb4   :  { %1101 = vmatmul.f32.vlgmr.msrb.gmra.mxu3 %v999_v57 }
  0xb5   :  { %1273 = vmatmul.msk.f32.gmra.mxu2 %vm333_vm0, %v1952_v15  ;;  %v298_v15 = vadd.f32 %v297_v42, %v259_v3  ;;  %vm2095_vm0 = vcmask 261120  }
  0xb6   :  { %vm2096_vm7 = vmmov %vm2095_vm0 }
  0xb7   :  { %1002 = vmatmul.f32.vlgmr.msrb.gmra.mxu0 %v1001_v30  ;;  %v327_v47 = vadd.f32 %v326_v20, %v298_v15  ;;  %vm2097_vm8 = vmmov %vm2095_vm0 }
  0xb8   :  { %vm2098_vm9 = vmmov %vm2095_vm0 }
  0xb9   :  { %1041 = vmatmul.f32.vlgmr.msrb.gmra.mxu1 %v997_v41  ;;  %vm2099_vm14 = vmmov %vm2095_vm0 }
  0xba   :  { %vm2100_vm2 = vmmov %vm2095_vm0 }
  0xbc   :  { %1107 = vmatmul.f32.gmra.mxu3 %v1007_v32 }
  0xbd   :  { %1071 = vmatmul.f32.vlgmr.msrb.gmra.mxu2 %v998_v8 }
  0xbf   :  { %1010 = vmatmul.f32.gmra.mxu0 %v1009_v19 }
  0xc1   :  { %1045 = vmatmul.f32.gmra.mxu1 %v1005_v58 }
  0xc5   :  { %1076 = vmatmul.f32.gmra.mxu2 %v1006_v24 }
  0xc7   :  { %1134 = vmatmul.f32.vlgmr.msra.gmra.mxu0 %v997_v41 }
  0xc9   :  { %1161 = vmatmul.f32.vlgmr.msra.gmra.mxu1 %v997_v41 }
  0xcf   :  { %1138 = vmatmul.f32.gmra.mxu0 %v1005_v58 }
  0xd1   :  { %1165 = vmatmul.f32.gmra.mxu1 %v1005_v58 }
 0x104   :  { %v540_v45 = vpop.f32.mrf.mxu0 }
 0x106   :  { %v582_v52 = vpop.f32.mrf.mxu1 }
 0x107   :  { %v484_v62 = vpop.f32.mrf.mxu3 }
 0x10c   :  { %v544_v10 = vpop.f32.mrf.mxu0 }
 0x10e   :  { %v587_v2 = vpop.f32.mrf.mxu1 }
 0x10f   :  { %v487_v35 = vpop.f32.mrf.mxu3 }
 0x110   :  { %v377_v49 = vpop.f32.mrf.mxu2 }
 0x111   :  { %v378_v38 = vadd.f32 %v377_v49, %v327_v47 }
 0x113   :  { %v485_v50 = vadd.f32 %v484_v62, %v378_v38 }
 0x114   :  { %v730_v59 = vpop.f32.mrf.mxu0 }
 0x115   :  { %v541_v60 = vadd.f32 %v540_v45, %v485_v50 }
 0x116   :  { %v799_v6 = vpop.f32.mrf.mxu1 }
 0x117   :  { %v694_v23 = vpop.f32.mrf.mxu3  ;;  %v583_v0 = vadd.f32 %v582_v52, %v541_v60 }
 0x118   :  { %v384_v25 = vpop.f32.mrf.mxu2 }
 0x119   :  { %v385_v55 = vadd.f32 %v384_v25, %v331_v7 }
 0x11b   :  { %v488_v16 = vadd.f32 %v487_v35, %v385_v55 }
 0x11c   :  { %v738_v40 = vpop.f32.mrf.mxu0 }
 0x11d   :  { %v545_v36 = vadd.f32 %v544_v10, %v488_v16 }
 0x11e   :  { %v803_v17 = vpop.f32.mrf.mxu1 }
 0x11f   :  { %v697_v43 = vpop.f32.mrf.mxu3  ;;  %v588_v27 = vadd.f32 %v587_v2, %v545_v36  ;;  %v1171_v2 = vld [vmem:[%s2076_s0] sm:$0xff] }
 0x120   :  { %v655_v5 = vpop.f32.mrf.mxu2 }
 0x121   :  { %v656_v13 = vadd.f32 %v655_v5, %v583_v0  ;;  %v1172_v5 = vld [vmem:[%s2076_s0 + $0x8] sm:$0xff] }
 0x123   :  { %v695_v41 = vadd.f32 %v694_v23, %v656_v13 }
 0x124   :  { %v841_v54 = vpop.f32.mrf.mxu0 }
 0x125   :  { %v731_v53 = vadd.f32 %v730_v59, %v695_v41 }
 0x126   :  { %v877_v31 = vpop.f32.mrf.mxu1 }
 0x127   :  { %v961_v11 = vpop.f32.mrf.mxu3  ;;  %v800_v30 = vadd.f32 %v799_v6, %v731_v53 }
 0x128   :  { %v658_v61 = vpop.f32.mrf.mxu2 }
 0x129   :  { %v659_v57 = vadd.f32 %v658_v61, %v588_v27  ;;  %v842_v19 = vadd.f32 %v841_v54, %v800_v30 }
 0x12b   :  { %v698_v32 = vadd.f32 %v697_v43, %v659_v57  ;;  %v878_v20 = vadd.f32 %v877_v31, %v842_v19  ;;  %v1339_v31 = vmov 32.0  }
 0x12c   :  { %v846_v12 = vpop.f32.mrf.mxu0  ;;  %1302 = vrcp.f32 %v1339_v31 }
 0x12d   :  { %v739_v4 = vadd.f32 %v738_v40, %v698_v32 }
 0x12e   :  { %v883_v33 = vpop.f32.mrf.mxu1 }
 0x12f   :  { %v965_v58 = vpop.f32.mrf.mxu3  ;;  %v804_v48 = vadd.f32 %v803_v17, %v739_v4 }
 0x130   :  { %v928_v37 = vpop.f32.mrf.mxu2 }
 0x131   :  { %v929_v21 = vadd.f32 %v928_v37, %v878_v20  ;;  %v847_v45 = vadd.f32 %v846_v12, %v804_v48  ;;  %v1300_v48 = vld [vmem:[%s2083_s7] ss:$0 sm:$0xff]  ;;  %s1340_s7 = smov [#allocation2]  }
 0x132   :  { %v1303_v55 = vpop.eup %1302  ;;  %s1250_s13 = sshll.u32 %s1340_s7, 4  ;;  %s1251_s13 = int_to_ptr.vmem [resolvable:$true] %s1250_s13 }
 0x133   :  { %v962_v63 = vadd.f32 %v961_v11, %v929_v21  ;;  %v884_v56 = vadd.f32 %v883_v33, %v847_v45  ;;  %v1182_v60 = vmul.f32 32.0, %v1303_v55  ;;  %vm1186_vm10 = vweird.f32 %v1303_v55 }
 0x134   :  { %v1003_v8 = vpop.f32.mrf.mxu0 }
 0x135   :  { %v1183_v61 = vsub.f32 1.0, %v1182_v60 }
 0x136   :  { %v1042_v18 = vpop.f32.mrf.mxu1 }
 0x137   :  { %v1102_v34 = vpop.f32.mrf.mxu3  ;;  %v1043_v42 = vadd.f32 %v1042_v18, %v1003_v8  ;;  %v1184_v16 = vmul.f32 %v1303_v55, %v1183_v61 }
 0x138   :  { %v932_v24 = vpop.f32.mrf.mxu2 }
 0x139   :  { %v933_v3 = vadd.f32 %v932_v24, %v884_v56  ;;  %v1185_v0 = vadd.f32 %v1303_v55, %v1184_v16 }
 0x13b   :  { %v966_v28 = vadd.f32 %v965_v58, %v933_v3  ;;  %v1187_v11 = vsel %vm1186_vm10, %v1303_v55, %v1185_v0 }
 0x13c   :  { %v1011_v39 = vpop.f32.mrf.mxu0 }
 0x13e   :  { %v1046_v29 = vpop.f32.mrf.mxu1 }
 0x13f   :  { %v1047_v10 = vadd.f32 %v1046_v29, %v1011_v39  ;;  %v1108_v49 = vpop.f32.mrf.mxu3 }
 0x140   :  { %v1072_v46 = vpop.f32.mrf.mxu2 }
 0x141   :  { %v1073_v51 = vadd.f32 %v1072_v46, %v1043_v42 }
 0x143   :  { %v1103_v22 = vadd.f32 %v1102_v34, %v1073_v51 }
 0x144   :  { %v1135_v9 = vpop.f32.mrf.mxu0 }
 0x145   :  { %v1136_v52 = vadd.f32 %v1135_v9, %v1103_v22  ;;  %v1301_v22 = vld [vmem:[%s2084_s8] ss:$0 sm:$0xff] }
 0x146   :  { %v1162_v62 = vpop.f32.mrf.mxu1 }
 0x147   :  { %v1163_v14 = vadd.f32 %v1162_v62, %v1136_v52 }
 0x148   :  { %v1077_v35 = vpop.f32.mrf.mxu2 }
 0x149   :  { %v1169_v59 = vadd.f32 %v1163_v14, %v962_v63  ;;  %v1078_v1 = vadd.f32 %v1077_v35, %v1047_v10 }
 0x14b   :  { %v1173_v6 = vadd.f32 %v1171_v2, %v1169_v59  ;;  %v1109_v23 = vadd.f32 %v1108_v49, %v1078_v1 }
 0x14c   :  { %v1139_v25 = vpop.f32.mrf.mxu0 }
 0x14d   :  { %v1140_v15 = vadd.f32 %v1139_v25, %v1109_v23  ;;  %v1175_v26 = vsel %vm2095_vm0, %v1173_v6, 0.0  ;;  %v1190_v40 = vmul.f32 %v1173_v6, %v1173_v6 }
 0x14e   :  { %v1166_v47 = vpop.f32.mrf.mxu1  ;;  %1176 = vadd.xlane.f32.xlu1 %v1175_v26 }
 0x14f   :  { %v1167_v17 = vadd.f32 %v1166_v47, %v1140_v15  ;;  %v1192_v38 = vsel %vm2096_vm7, %v1190_v40, 0.0 }
 0x150   :  { %1193 = vadd.xlane.f32.xlu0 %v1192_v38 }
 0x151   :  { %v1170_v44 = vadd.f32 %v1167_v17, %v966_v28 }
 0x153   :  { %v1174_v43 = vadd.f32 %v1172_v5, %v1170_v44 }
 0x155   :  { %v1178_v50 = vsel %vm2097_vm8, %v1174_v43, 0.0  ;;  %v1191_v54 = vmul.f32 %v1174_v43, %v1174_v43 }
 0x156   :  { %1179 = vadd.xlane.f32.xlu2 %v1178_v50 }
 0x157   :  { %v1195_v7 = vsel %vm2098_vm9, %v1191_v54, 0.0 }
 0x15e   :  { %1196 = vadd.xlane.f32.xlu2 %v1195_v7 }
 0x1c1   :  { %v1177_v12 = vpop.xlane.xlu1 %1176 }
 0x1c2   :  { %v1188_v13 = vmul.f32 %v1187_v11, %v1177_v12 }
 0x1c3   :  { %v1194_v33 = vpop.xlane.xlu0 %1193 }
 0x1c4   :  { %v1200_v36 = vmul.f32 %v1188_v13, %v1188_v13  ;;  %v1198_v37 = vmul.f32 %v1194_v33, %v1187_v11  ;;  %v1228_v20 = vsub.f32 %v1173_v6, %v1188_v13 }
 0x1c6   :  { %v1202_v41 = vsub.f32 %v1198_v37, %v1200_v36 }
 0x1c8   :  { %v1204_v27 = vmax.f32 %v1202_v41, 0.0 }
 0x1c9   :  { %v1180_v8 = vpop.xlane.xlu2 %1179 }
 0x1ca   :  { %v1206_v53 = vadd.f32 1e-12, %v1204_v27  ;;  %v1189_v57 = vmul.f32 %v1187_v11, %v1180_v8 }
 0x1cc   :  { %1304 = vrsqrt.f32 %v1206_v53  ;;  %v1201_v24 = vmul.f32 %v1189_v57, %v1189_v57  ;;  %vm1214_vm12 = vweird.f32 %v1206_v53  ;;  %v1229_v35 = vsub.f32 %v1174_v43, %v1189_v57 }
 0x1d1   :  { %v1197_v58 = vpop.xlane.xlu2 %1196 }
 0x1d2   :  { %v1305_v18 = vpop.eup %1304  ;;  %v1199_v30 = vmul.f32 %v1197_v58, %v1187_v11 }
 0x1d3   :  { %v1209_v32 = vmul.f32 %v1305_v18, %v1206_v53  ;;  %vm1215_vm11 = vweird.f32 %v1305_v18 }
 0x1d4   :  { %v1203_v39 = vsub.f32 %v1199_v30, %v1201_v24  ;;  %vm1216_vm13 = vmor %vm1214_vm12, %vm1215_vm11 }
 0x1d5   :  { %v1210_v19 = vmul.f32 %v1305_v18, %v1209_v32 }
 0x1d6   :  { %v1205_v4 = vmax.f32 %v1203_v39, 0.0 }
 0x1d7   :  { %v1211_v29 = vmul.f32 0.5, %v1210_v19 }
 0x1d8   :  { %v1207_v34 = vadd.f32 1e-12, %v1205_v4 }
 0x1d9   :  { %v1212_v42 = vsub.f32 1.5, %v1211_v29 }
 0x1da   :  { %1306 = vrsqrt.f32 %v1207_v34  ;;  %vm1224_vm1 = vweird.f32 %v1207_v34 }
 0x1db   :  { %v1213_v46 = vmul.f32 %v1305_v18, %v1212_v42 }
 0x1dd   :  { %v1217_v51 = vsel %vm1216_vm13, %v1305_v18, %v1213_v46 }
 0x1de   :  { %v1230_v21 = vmul.f32 %v1228_v20, %v1217_v51 }
 0x1e0   :  { %v1307_v9 = vpop.eup %1306  ;;  %v1236_v45 = vmul.f32 %v1300_v48, %v1230_v21 }
 0x1e1   :  { %v1219_v52 = vmul.f32 %v1307_v9, %v1207_v34  ;;  %vm1225_vm15 = vweird.f32 %v1307_v9 }
 0x1e2   :  { %v1242_v62 = vadd.f32 %v1301_v22, %v1236_v45  ;;  %vm1226_vm3 = vmor %vm1224_vm1, %vm1225_vm15 }
 0x1e3   :  { %v1220_v63 = vmul.f32 %v1307_v9, %v1219_v52 }
 0x1e4   :  { %1244 = vst.msk [vmem:[#allocation2] sm:$0xff] %vm2099_vm14, %v1242_v62 }
 0x1e5   :  { %v1221_v10 = vmul.f32 0.5, %v1220_v63 }
 0x1e7   :  { %v1222_v14 = vsub.f32 1.5, %v1221_v10 }
 0x1e9   :  { %v1223_v2 = vmul.f32 %v1307_v9, %v1222_v14 }
 0x1eb   :  { %v1227_v49 = vsel %vm1226_vm3, %v1307_v9, %v1223_v2 }
 0x1ec   :  { %v1231_v56 = vmul.f32 %v1229_v35, %v1227_v49 }
 0x1ee   :  { %v1237_v59 = vmul.f32 %v1300_v48, %v1231_v56 }
 0x1f0   :  { %v1243_v1 = vadd.f32 %v1301_v22, %v1237_v59 }
 0x1f2   :  { %1245 = vst.msk [vmem:[#allocation2 + $0x8] sm:$0xff] %vm2100_vm2, %v1243_v1 }
 0x1f3   :  { %1258 = dma.vmem_to_hbm [thread:$0]  %s1251_s13, 256, %s1253_s15, [#allocation3], %s1341_s16, %s1341_s16, %s1342_s17  }
 0x1f4   :  { %1332 = dma.done.wait [#allocation3], 256  }
 0x1f5   :  { %1333 = vsyncadd [#allocation3], 4294967040 }
 0x1f6   :  { %1263 = vsyncpa [#allocation3], 1 }

</bundles_post_ra>
